<compile_context>
chip_gen: v5e
topology: v5e:2x2
jax: 0.10.0
libtpu: 0.0.40
codegen_flags: <defaults>
</compile_context>

<pallas_src>
import functools

import jax
import jax.numpy as jnp
from jax import lax
from jax.experimental import pallas as pl
from jax.experimental.pallas import tpu as pltpu

NEG_SLOPE = 0.2  # nn.LeakyReLU(negative_slope=0.2)


def _is_pow2(n):
    return n > 0 and (n & (n - 1)) == 0


def sfb_kernel(x_ref, w1_ref, w2_ref, w3_ref, o_ref, *, H, W):
    # x_ref : (Cp, N)      N = B*H*W; channels on sublanes, batch*pixels on lanes
    # w1_ref: (Cp, 9*Cp)   conv1 3x3 weights, columns ordered (ky, kx, ci)
    # w2_ref: (Cp, 9*Cp)   conv2 3x3 weights, same ordering
    # w3_ref: (Cp, Cp)     folded SFB 1x1 conv weights: w3[:, :C] + w3[:, C:]
    # o_ref : (Cp, N)
    Cp, N = x_ref.shape
    HW = H * W

    x = x_ref[...].astype(jnp.float32)  # (Cp, N), lane-dense load

    # --- halo-validity masks: computed once, reused by both convs -----------
    p = lax.broadcasted_iota(jnp.int32, (Cp, N), 1)
    col = (p & (W - 1)) if _is_pow2(W) else (p % W)          # x position in row
    pin = (p & (HW - 1)) if _is_pow2(HW) else (p % HW)       # pixel index in image
    row_m = {-1: pin >= W, 0: None, 1: pin < HW - W}          # dy valid
    col_m = {-1: col >= 1, 0: None, 1: col <= W - 2}          # dx valid

    offsets, tap_masks = [], []
    for dy in (-1, 0, 1):
        for dx in (-1, 0, 1):
            offsets.append(dy * W + dx)
            rm, cm = row_m[dy], col_m[dx]
            m = rm if cm is None else (cm if rm is None else rm & cm)
            tap_masks.append(m)

    def im2col(a):
        # Stack the 9 shifted-and-masked 3x3 taps of a flattened (Cp, N) image
        # batch into one (9*Cp, N) matrix.  Lane rolls that wrap across image
        # (or batch) boundaries are zeroed by the masks, reproducing the conv's
        # zero padding exactly.
        taps = []
        for off, m in zip(offsets, tap_masks):
            t = a if off == 0 else pltpu.roll(a, (-off) % N, axis=1)
            if m is not None:
                t = jnp.where(m, t, 0.0)
            taps.append(t)
        return jnp.concatenate(taps, axis=0)  # (9*Cp, N), sublane-tile aligned

    # conv3x3(pad=1) + LeakyReLU(0.2): single MXU matmul, K = 9*Cp.
    y = jnp.dot(w1_ref[...], im2col(x), preferred_element_type=jnp.float32)
    y = jnp.where(y >= 0, y, NEG_SLOPE * y)

    # conv3x3(pad=1) + residual add  -> SpatialTransform output s.
    s = jnp.dot(w2_ref[...], im2col(y), preferred_element_type=jnp.float32) + x

    # SFB head: conv1x1(concat([s, s], channel)) == dot(w3[:, :C] + w3[:, C:], s).
    out = jnp.dot(w3_ref[...], s, preferred_element_type=jnp.float32)

    o_ref[...] = out.astype(o_ref.dtype)  # lane-dense store (N multiple of 128)


def sfb_forward(x_nchw, w1_oihw, w2_oihw, w3_oihw):
    """SFB forward. x: (B, C, H, W); w1/w2: (C, C, 3, 3); w3: (C, 2*C, 1, 1)."""
    B, C, H, W = x_nchw.shape
    HW = H * W
    N = B * HW
    Cp = ((C + 7) // 8) * 8  # pad channels to a whole 8-sublane tile
    assert w1_oihw.shape == (C, C, 3, 3) and w2_oihw.shape == (C, C, 3, 3)
    assert w3_oihw.shape == (C, 2 * C, 1, 1)

    # Weight prep (parameters -- transformed once on the host):
    #   pad to Cp, then (O, I, 3, 3) -> (O, 3, 3, I) -> (O, 9*I),
    #   column order (ky, kx, ci), matching the in-kernel tap stacking order.
    def prep3x3(w):
        wp = jnp.zeros((Cp, Cp, 3, 3), jnp.float32).at[:C, :C].set(
            w.astype(jnp.float32))
        return jnp.transpose(wp, (0, 2, 3, 1)).reshape(Cp, 9 * Cp)

    wm1 = prep3x3(w1_oihw)
    wm2 = prep3x3(w2_oihw)
    # Fold the duplicate-concat 1x1 conv: conv1x1([s, s]) == (w3a + w3b) @ s.
    w3f = (w3_oihw[:, :C, 0, 0] + w3_oihw[:, C:, 0, 0]).astype(jnp.float32)
    w3m = jnp.zeros((Cp, Cp), jnp.float32).at[:C, :C].set(w3f)

    # Channel-major, zero-padded activation slab: (Cp, B*H*W).  Tiny host-side
    # transpose (8 KiB here) in exchange for a single lane-dense kernel step.
    xpad = jnp.pad(x_nchw, ((0, 0), (0, Cp - C), (0, 0), (0, 0)))
    x2d = jnp.transpose(xpad, (1, 0, 2, 3)).reshape(Cp, N)

    out2d = pl.pallas_call(
        functools.partial(sfb_kernel, H=H, W=W),
        out_shape=jax.ShapeDtypeStruct((Cp, N), x_nchw.dtype),
    )(x2d, wm1, wm2, w3m)

    out = jnp.transpose(out2d.reshape(Cp, B, H, W), (1, 0, 2, 3))
    return out[:, :C]


def sfb_reference(x, w1, w2, w3):
    """Pure-JAX NCHW reference matching the PyTorch SFB forward semantics."""
    dn = lax.conv_dimension_numbers(x.shape, w1.shape, ("NCHW", "OIHW", "NCHW"))
    y = lax.conv_general_dilated(x, w1, (1, 1), ((1, 1), (1, 1)),
                                 dimension_numbers=dn)
    y = jnp.where(y >= 0, y, NEG_SLOPE * y)
    y = lax.conv_general_dilated(y, w2, (1, 1), ((1, 1), (1, 1)),
                                 dimension_numbers=dn)
    s = y + x                                    # SpatialTransform(x)
    cat = jnp.concatenate([s, s], axis=1)        # SFB uses the spatial branch twice
    dn1 = lax.conv_dimension_numbers(cat.shape, w3.shape, ("NCHW", "OIHW", "NCHW"))
    return lax.conv_general_dilated(cat, w3, (1, 1), ((0, 0), (0, 0)),
                                    dimension_numbers=dn1)


if __name__ == "__main__":
    key = jax.random.PRNGKey(0)
    k1, k2, k3, k4 = jax.random.split(key, 4)

    B, C, H, W = 2, 4, 16, 16          # in_channels == out_channels == 4
    x = jax.random.normal(k1, (B, C, H, W), dtype=jnp.float32)
    # Conv2d(C, C, 3, bias=False) weights: (out, in, 3, 3)
    w1 = 0.1 * jax.random.normal(k2, (C, C, 3, 3), dtype=jnp.float32)
    w2 = 0.1 * jax.random.normal(k3, (C, C, 3, 3), dtype=jnp.float32)
    # SFB.conv1: Conv2d(2*C, C, 1, bias=False) weights: (out, 2*in, 1, 1)
    w3 = 0.1 * jax.random.normal(k4, (C, 2 * C, 1, 1), dtype=jnp.float32)

    out = sfb_forward(x, w1, w2, w3)
    out = jax.block_until_ready(out)

    ref = sfb_reference(x, w1, w2, w3)
    assert out.shape == ref.shape and out.dtype == ref.dtype
    err = float(jnp.max(jnp.abs(out - ref)))
    assert jnp.allclose(out, ref, atol=1e-4, rtol=1e-4), err

    print("KERNEL_OK")
</pallas_src>

<mosaic_0001>
module attributes {stable_mosaic.version = 11 : i64} {
  func.func @sfb_kernel(%arg0: memref<8x512xf32, #tpu.memory_space<vmem>>, %arg1: memref<8x72xf32, #tpu.memory_space<vmem>>, %arg2: memref<8x72xf32, #tpu.memory_space<vmem>>, %arg3: memref<8x8xf32, #tpu.memory_space<vmem>>, %arg4: memref<8x512xf32, #tpu.memory_space<vmem>>) attributes {dimension_semantics = [], scalar_prefetch = 0 : i64, scratch_operands = 0 : i64, tpu.core_type = #tpu.core_type<tc>} {
    %c0 = arith.constant 0 : index
    %c0_0 = arith.constant 0 : index
    %0 = vector.load %arg0[%c0, %c0_0] : memref<8x512xf32, #tpu.memory_space<vmem>>, vector<8x512xf32>
    %1 = tpu.iota {dimensions = array<i32: 1>} : vector<8x512xi32>
    %c15_i32 = arith.constant 15 : i32
    %2 = vector.broadcast %c15_i32 : i32 to vector<8x512xi32>
    %3 = arith.andi %1, %2 : vector<8x512xi32>
    %c255_i32 = arith.constant 255 : i32
    %4 = vector.broadcast %c255_i32 : i32 to vector<8x512xi32>
    %5 = arith.andi %1, %4 : vector<8x512xi32>
    %c16_i32 = arith.constant 16 : i32
    %6 = vector.broadcast %c16_i32 : i32 to vector<8x512xi32>
    %7 = arith.cmpi sge, %5, %6 : vector<8x512xi32>
    %c240_i32 = arith.constant 240 : i32
    %8 = vector.broadcast %c240_i32 : i32 to vector<8x512xi32>
    %9 = arith.cmpi slt, %5, %8 : vector<8x512xi32>
    %c1_i32 = arith.constant 1 : i32
    %10 = vector.broadcast %c1_i32 : i32 to vector<8x512xi32>
    %11 = arith.cmpi sge, %3, %10 : vector<8x512xi32>
    %c14_i32 = arith.constant 14 : i32
    %12 = vector.broadcast %c14_i32 : i32 to vector<8x512xi32>
    %13 = arith.cmpi sle, %3, %12 : vector<8x512xi32>
    %14 = arith.andi %7, %11 : vector<8x512xi1>
    %15 = arith.andi %7, %13 : vector<8x512xi1>
    %16 = arith.andi %9, %11 : vector<8x512xi1>
    %17 = arith.andi %9, %13 : vector<8x512xi1>
    %c0_1 = arith.constant 0 : index
    %c0_2 = arith.constant 0 : index
    %18 = vector.load %arg1[%c0_1, %c0_2] : memref<8x72xf32, #tpu.memory_space<vmem>>, vector<8x72xf32>
    %c17_i32 = arith.constant 17 : i32
    %19 = tpu.dynamic_rotate %0 by %c17_i32 dim 1 : vector<8x512xf32>, i32 -> vector<8x512xf32>
    %cst = arith.constant 0.000000e+00 : f32
    %20 = vector.broadcast %cst : f32 to vector<8x512xf32>
    %21 = arith.select %14, %19, %20 : vector<8x512xi1>, vector<8x512xf32>
    %c16_i32_3 = arith.constant 16 : i32
    %22 = tpu.dynamic_rotate %0 by %c16_i32_3 dim 1 : vector<8x512xf32>, i32 -> vector<8x512xf32>
    %cst_4 = arith.constant 0.000000e+00 : f32
    %23 = vector.broadcast %cst_4 : f32 to vector<8x512xf32>
    %24 = arith.select %7, %22, %23 : vector<8x512xi1>, vector<8x512xf32>
    %c15_i32_5 = arith.constant 15 : i32
    %25 = tpu.dynamic_rotate %0 by %c15_i32_5 dim 1 : vector<8x512xf32>, i32 -> vector<8x512xf32>
    %cst_6 = arith.constant 0.000000e+00 : f32
    %26 = vector.broadcast %cst_6 : f32 to vector<8x512xf32>
    %27 = arith.select %15, %25, %26 : vector<8x512xi1>, vector<8x512xf32>
    %c1_i32_7 = arith.constant 1 : i32
    %28 = tpu.dynamic_rotate %0 by %c1_i32_7 dim 1 : vector<8x512xf32>, i32 -> vector<8x512xf32>
    %cst_8 = arith.constant 0.000000e+00 : f32
    %29 = vector.broadcast %cst_8 : f32 to vector<8x512xf32>
    %30 = arith.select %11, %28, %29 : vector<8x512xi1>, vector<8x512xf32>
    %c511_i32 = arith.constant 511 : i32
    %31 = tpu.dynamic_rotate %0 by %c511_i32 dim 1 : vector<8x512xf32>, i32 -> vector<8x512xf32>
    %cst_9 = arith.constant 0.000000e+00 : f32
    %32 = vector.broadcast %cst_9 : f32 to vector<8x512xf32>
    %33 = arith.select %13, %31, %32 : vector<8x512xi1>, vector<8x512xf32>
    %c497_i32 = arith.constant 497 : i32
    %34 = tpu.dynamic_rotate %0 by %c497_i32 dim 1 : vector<8x512xf32>, i32 -> vector<8x512xf32>
    %cst_10 = arith.constant 0.000000e+00 : f32
    %35 = vector.broadcast %cst_10 : f32 to vector<8x512xf32>
    %36 = arith.select %16, %34, %35 : vector<8x512xi1>, vector<8x512xf32>
    %c496_i32 = arith.constant 496 : i32
    %37 = tpu.dynamic_rotate %0 by %c496_i32 dim 1 : vector<8x512xf32>, i32 -> vector<8x512xf32>
    %cst_11 = arith.constant 0.000000e+00 : f32
    %38 = vector.broadcast %cst_11 : f32 to vector<8x512xf32>
    %39 = arith.select %9, %37, %38 : vector<8x512xi1>, vector<8x512xf32>
    %c495_i32 = arith.constant 495 : i32
    %40 = tpu.dynamic_rotate %0 by %c495_i32 dim 1 : vector<8x512xf32>, i32 -> vector<8x512xf32>
    %cst_12 = arith.constant 0.000000e+00 : f32
    %41 = vector.broadcast %cst_12 : f32 to vector<8x512xf32>
    %42 = arith.select %17, %40, %41 : vector<8x512xi1>, vector<8x512xf32>
    %43 = tpu.concatenate %21, %24, %27, %30, %0, %33, %36, %39, %42 in 0 : vector<8x512xf32>, vector<8x512xf32>, vector<8x512xf32>, vector<8x512xf32>, vector<8x512xf32>, vector<8x512xf32>, vector<8x512xf32>, vector<8x512xf32>, vector<8x512xf32> -> vector<72x512xf32>
    %cst_13 = arith.constant dense<0.000000e+00> : vector<8x512xf32>
    %44 = tpu.matmul %18, %43, %cst_13 {dimension_numbers = #tpu.dot_dimension_numbers<[1], [0], [0], [1], [0, 0, 1, 1], [], []>} : vector<8x72xf32>, vector<72x512xf32>, vector<8x512xf32> -> vector<8x512xf32>
    %cst_14 = arith.constant 0.000000e+00 : f32
    %45 = vector.broadcast %cst_14 : f32 to vector<8x512xf32>
    %46 = arith.cmpf oge, %44, %45 : vector<8x512xf32>
    %cst_15 = arith.constant 2.000000e-01 : f32
    %47 = vector.broadcast %cst_15 : f32 to vector<8x512xf32>
    %48 = arith.mulf %47, %44 : vector<8x512xf32>
    %49 = arith.select %46, %44, %48 : vector<8x512xi1>, vector<8x512xf32>
    %c0_16 = arith.constant 0 : index
    %c0_17 = arith.constant 0 : index
    %50 = vector.load %arg2[%c0_16, %c0_17] : memref<8x72xf32, #tpu.memory_space<vmem>>, vector<8x72xf32>
    %c17_i32_18 = arith.constant 17 : i32
    %51 = tpu.dynamic_rotate %49 by %c17_i32_18 dim 1 : vector<8x512xf32>, i32 -> vector<8x512xf32>
    %cst_19 = arith.constant 0.000000e+00 : f32
    %52 = vector.broadcast %cst_19 : f32 to vector<8x512xf32>
    %53 = arith.select %14, %51, %52 : vector<8x512xi1>, vector<8x512xf32>
    %c16_i32_20 = arith.constant 16 : i32
    %54 = tpu.dynamic_rotate %49 by %c16_i32_20 dim 1 : vector<8x512xf32>, i32 -> vector<8x512xf32>
    %cst_21 = arith.constant 0.000000e+00 : f32
    %55 = vector.broadcast %cst_21 : f32 to vector<8x512xf32>
    %56 = arith.select %7, %54, %55 : vector<8x512xi1>, vector<8x512xf32>
    %c15_i32_22 = arith.constant 15 : i32
    %57 = tpu.dynamic_rotate %49 by %c15_i32_22 dim 1 : vector<8x512xf32>, i32 -> vector<8x512xf32>
    %cst_23 = arith.constant 0.000000e+00 : f32
    %58 = vector.broadcast %cst_23 : f32 to vector<8x512xf32>
    %59 = arith.select %15, %57, %58 : vector<8x512xi1>, vector<8x512xf32>
    %c1_i32_24 = arith.constant 1 : i32
    %60 = tpu.dynamic_rotate %49 by %c1_i32_24 dim 1 : vector<8x512xf32>, i32 -> vector<8x512xf32>
    %cst_25 = arith.constant 0.000000e+00 : f32
    %61 = vector.broadcast %cst_25 : f32 to vector<8x512xf32>
    %62 = arith.select %11, %60, %61 : vector<8x512xi1>, vector<8x512xf32>
    %c511_i32_26 = arith.constant 511 : i32
    %63 = tpu.dynamic_rotate %49 by %c511_i32_26 dim 1 : vector<8x512xf32>, i32 -> vector<8x512xf32>
    %cst_27 = arith.constant 0.000000e+00 : f32
    %64 = vector.broadcast %cst_27 : f32 to vector<8x512xf32>
    %65 = arith.select %13, %63, %64 : vector<8x512xi1>, vector<8x512xf32>
    %c497_i32_28 = arith.constant 497 : i32
    %66 = tpu.dynamic_rotate %49 by %c497_i32_28 dim 1 : vector<8x512xf32>, i32 -> vector<8x512xf32>
    %cst_29 = arith.constant 0.000000e+00 : f32
    %67 = vector.broadcast %cst_29 : f32 to vector<8x512xf32>
    %68 = arith.select %16, %66, %67 : vector<8x512xi1>, vector<8x512xf32>
    %c496_i32_30 = arith.constant 496 : i32
    %69 = tpu.dynamic_rotate %49 by %c496_i32_30 dim 1 : vector<8x512xf32>, i32 -> vector<8x512xf32>
    %cst_31 = arith.constant 0.000000e+00 : f32
    %70 = vector.broadcast %cst_31 : f32 to vector<8x512xf32>
    %71 = arith.select %9, %69, %70 : vector<8x512xi1>, vector<8x512xf32>
    %c495_i32_32 = arith.constant 495 : i32
    %72 = tpu.dynamic_rotate %49 by %c495_i32_32 dim 1 : vector<8x512xf32>, i32 -> vector<8x512xf32>
    %cst_33 = arith.constant 0.000000e+00 : f32
    %73 = vector.broadcast %cst_33 : f32 to vector<8x512xf32>
    %74 = arith.select %17, %72, %73 : vector<8x512xi1>, vector<8x512xf32>
    %75 = tpu.concatenate %53, %56, %59, %62, %49, %65, %68, %71, %74 in 0 : vector<8x512xf32>, vector<8x512xf32>, vector<8x512xf32>, vector<8x512xf32>, vector<8x512xf32>, vector<8x512xf32>, vector<8x512xf32>, vector<8x512xf32>, vector<8x512xf32> -> vector<72x512xf32>
    %cst_34 = arith.constant dense<0.000000e+00> : vector<8x512xf32>
    %76 = tpu.matmul %50, %75, %cst_34 {dimension_numbers = #tpu.dot_dimension_numbers<[1], [0], [0], [1], [0, 0, 1, 1], [], []>} : vector<8x72xf32>, vector<72x512xf32>, vector<8x512xf32> -> vector<8x512xf32>
    %77 = arith.addf %76, %0 : vector<8x512xf32>
    %c0_35 = arith.constant 0 : index
    %c0_36 = arith.constant 0 : index
    %78 = vector.load %arg3[%c0_35, %c0_36] : memref<8x8xf32, #tpu.memory_space<vmem>>, vector<8x8xf32>
    %cst_37 = arith.constant dense<0.000000e+00> : vector<8x512xf32>
    %79 = tpu.matmul %78, %77, %cst_37 {dimension_numbers = #tpu.dot_dimension_numbers<[1], [0], [0], [1], [0, 0, 1, 1], [], []>} : vector<8x8xf32>, vector<8x512xf32>, vector<8x512xf32> -> vector<8x512xf32>
    %c0_38 = arith.constant 0 : index
    %c0_39 = arith.constant 0 : index
    %80 = vector.load %arg4[%c0_38, %c0_39] : memref<8x512xf32, #tpu.memory_space<vmem>>, vector<8x512xf32>
    tpu.vector_store %arg4[%c0_38, %c0_39], %79 {strides = array<i32>} : memref<8x512xf32, #tpu.memory_space<vmem>>, vector<8x512xf32>,
    return
  }
}

</mosaic_0001>

<bundles_post_ra>
// kernel: tpu_custom_call.1
= control target key start
LH: loop header
LB: loop body
LE: loop exit
PB: predicated region body
PF: predicated region fallthrough
CT: control target
= control target key end

     0   :  { %9 = vsyncpa [#allocation3], 0  ;;  %s1520_s0 = inlined_call_operand.hbm [shape: f32[8,512], index: 0, kind: input, shape index: {}]   ;;  %s1521_s1 = inlined_call_operand.hbm [shape: f32[8,72], index: 1, kind: input, shape index: {}]   ;;  %s1522_s2 = inlined_call_operand.hbm [shape: f32[8,72], index: 2, kind: input, shape index: {}]   ;;  %s1523_s3 = inlined_call_operand.hbm [shape: f32[8,8], index: 3, kind: input, shape index: {}]   ;;  %s1524_s4 = inlined_call_operand.hbm [shape: f32[8,512], index: 4, kind: output, shape index: {}]  }
   0x1   :  { %10 = vsyncpa [#allocation6], 0 }
   0x2   :  { %11 = vsyncpa [#allocation9], 0  ;;  %s29_s17 = sshll.u32 %s1521_s1, 4  ;;  %s30_s17 = int_to_ptr.hbm [resolvable:$true] %s29_s17 }
   0x3   :  { %12 = vsyncpa [#allocation4], 0  ;;  %s884_s18 = smov [#allocation5]   ;;  %s18_s22 = sshll.u32 %s1520_s0, 4  ;;  %s19_s22 = int_to_ptr.hbm [resolvable:$true] %s18_s22 }
   0x4   :  { %s31_s19 = sshll.u32 %s884_s18, 4  ;;  %s885_s23 = smov [#allocation2]   ;;  %s32_s19 = int_to_ptr.vmem [resolvable:$true] %s31_s19 }
   0x5   :  { %34 = dma.hbm_to_vmem [thread:$0]  %s30_s17, 128, %s32_s19, [#allocation6]  }
   0x6   :  { %s20_s24 = sshll.u32 %s885_s23, 4  ;;  %s40_s27 = sshll.u32 %s1522_s2, 4  ;;  %s21_s24 = int_to_ptr.vmem [resolvable:$true] %s20_s24  ;;  %s41_s27 = int_to_ptr.hbm [resolvable:$true] %s40_s27 }
   0x7   :  { %23 = dma.hbm_to_vmem [thread:$0]  %s19_s22, 512, %s21_s24, [#allocation3]  }
   0x8   :  { %s51_s29 = sshll.u32 %s1523_s3, 4  ;;  %s886_s30 = smov [#allocation7]   ;;  %s52_s29 = int_to_ptr.hbm [resolvable:$true] %s51_s29 }
   0x9   :  { %s42_s5 = sshll.u32 %s886_s30, 4  ;;  %s887_s0 = smov [#allocation8]   ;;  %s43_s5 = int_to_ptr.vmem [resolvable:$true] %s42_s5 }
   0xa   :  { %45 = dma.hbm_to_vmem [thread:$0]  %s41_s27, 128, %s43_s5, [#allocation6]  }
   0xb   :  { %s53_s6 = sshll.u32 %s887_s0, 4  ;;  %s54_s6 = int_to_ptr.vmem [resolvable:$true] %s53_s6 }
   0xc   :  { %56 = dma.hbm_to_vmem [thread:$0]  %s52_s29, 128, %s54_s6, [#allocation9]  }
   0xd   :  { %876 = dma.done.wait [#allocation3], 512  }
   0xe   :  { %877 = vsyncadd [#allocation3], 4294966784 }
   0xf   :  { %878 = dma.done.wait [#allocation6], 256  }
  0x10   :  { %879 = vsyncadd [#allocation6], 4294967040 }
  0x11   :  { %880 = dma.done.wait [#allocation9], 128  }
  0x12   :  { %881 = vsyncadd [#allocation9], 4294967168  ;;  %v934_v0 = vld [vmem:[#allocation2 + $0x18] sm:$0xff]  ;;  %v936_v1 = vld [vmem:[#allocation2 + $0x10] sm:$0xff]  ;;  %s888_s2 = smov 111   ;;  %s889_s3 = smov 112   ;;  %v77_v4 = vlaneseq }
  0x13   :  { %v938_v2 = vld [vmem:[#allocation2] sm:$0xff]  ;;  %248 = vrot.lane.b32.xlu1 %v934_v0, %s888_s2  ;;  %229 = vrot.lane.b32.xlu2 %v936_v1, %s889_s3  ;;  %s890_s7 = smov 113   ;;  %s891_s8 = smov 127   ;;  %v964_v3 = vld [vmem:[#allocation2 + $0x8] sm:$0xff]  ;;  %v1554_v27 = vmov 0  ;;  %v1566_v61 = vmov 0 }
  0x14   :  { %242 = vrot.lane.b32.xlu0 %v938_v2, %s888_s2  ;;  %s892_s9 = smov 1   ;;  %s893_s10 = smov 15   ;;  %v1008_v6 = vand.u32 127, %v77_v4 }
  0x15   :  { %s894_s11 = smov 16   ;;  %s895_s12 = smov 17  }
  0x16   :  { %v81_v7 = vadd.s32 384, %v1008_v6  ;;  %vm1531_vm2 = vcmp.lt.s32.totalorder %v1008_v6, 111  ;;  %v1025_v14 = vadd.s32 256, %v1008_v6  ;;  %vm1530_vm5 = vcmp.lt.s32.totalorder %v1008_v6, 112  ;;  %s896_s13 = smov [#allocation10]   ;;  %s663_s17 = sshll.u32 %s1524_s4, 4  ;;  %s664_s17 = int_to_ptr.hbm [resolvable:$true] %s663_s17 }
  0x17   :  { %vm1529_vm7 = vcmp.lt.s32.totalorder %v1008_v6, 113  ;;  %v79_v32 = vadd.s32 128, %v1008_v6  ;;  %vm1533_vm10 = vcmp.lt.s32.totalorder %v1008_v6, 127  ;;  %v82_v40 = vand.u32 15, %v1008_v6  ;;  %s661_s14 = sshll.u32 %s896_s13, 4  ;;  %s662_s14 = int_to_ptr.vmem [resolvable:$true] %s661_s14 }
  0x18   :  { %v85_v9 = vand.u32 15, %v81_v7  ;;  %v89_v10 = vand.u32 255, %v81_v7  ;;  %v84_v18 = vand.u32 15, %v1025_v14  ;;  %v88_v57 = vand.u32 255, %v1025_v14 }
  0x19   :  { %v83_v37 = vand.u32 15, %v79_v32  ;;  %v87_v38 = vand.u32 255, %v79_v32  ;;  %vm1098_vm13 = vcmp.le.s32.totalorder %v82_v40, 14 }
  0x1a   :  { %vm1011_vm0 = vcmp.lt.s32.totalorder %v89_v10, 240  ;;  %vm1015_vm1 = vcmp.le.s32.totalorder %v85_v9, 14  ;;  %vm1035_vm4 = vcmp.le.s32.totalorder %v84_v18, 14  ;;  %vm1051_vm6 = vcmp.ge.s32.totalorder %v85_v9, 1 }
  0x1b   :  { %231 = vrot.lane.b32.xlu2 %v934_v0, %s889_s3  ;;  %225 = vrot.lane.b32.xlu1 %v938_v2, %s889_s3  ;;  %vm1526_vm3 = vmand %vm1011_vm0, %vm1015_vm1  ;;  %vm1056_vm8 = vcmp.ge.s32.totalorder %v84_v18, 1  ;;  %vm1089_vm11 = vcmp.lt.s32.totalorder %v87_v38, 240  ;;  %vm1093_vm12 = vcmp.le.s32.totalorder %v83_v37, 14  ;;  %vm1106_vm15 = vcmp.ge.s32.totalorder %v83_v37, 1 }
  0x1c   :  { %246 = vrot.lane.b32.xlu0 %v936_v1, %s888_s2  ;;  %v1555_v27 = vsel %vm1056_vm8, 4294967295, %v1554_v27  ;;  %vm1525_vm9 = vmand %vm1011_vm0, %vm1051_vm6 }
  0x1d   :  { %vm1527_vm14 = vmand %vm1089_vm11, %vm1093_vm12 }
  0x23   :  { %214 = vrot.lane.b32.xlu2 %v934_v0, %s890_s7  ;;  %212 = vrot.lane.b32.xlu1 %v936_v1, %s890_s7 }
  0x24   :  { %208 = vrot.lane.b32.xlu0 %v938_v2, %s890_s7 }
  0x2b   :  { %197 = vrot.lane.b32.xlu2 %v934_v0, %s891_s8  ;;  %195 = vrot.lane.b32.xlu1 %v936_v1, %s891_s8 }
  0x2c   :  { %191 = vrot.lane.b32.xlu0 %v938_v2, %s891_s8 }
  0x33   :  { %176 = vrot.lane.b32.xlu2 %v964_v3, %s892_s9  ;;  %227 = vrot.lane.b32.xlu1 %v964_v3, %s889_s3 }
  0x34   :  { %244 = vrot.lane.b32.xlu0 %v964_v3, %s888_s2 }
  0x3b   :  { %210 = vrot.lane.b32.xlu2 %v964_v3, %s890_s7  ;;  %180 = vrot.lane.b32.xlu1 %v934_v0, %s892_s9 }
  0x3c   :  { %178 = vrot.lane.b32.xlu0 %v936_v1, %s892_s9 }
  0x43   :  { %163 = vrot.lane.b32.xlu2 %v934_v0, %s893_s10  ;;  %161 = vrot.lane.b32.xlu1 %v936_v1, %s893_s10 }
  0x44   :  { %159 = vrot.lane.b32.xlu0 %v964_v3, %s893_s10 }
  0x4b   :  { %144 = vrot.lane.b32.xlu2 %v936_v1, %s894_s11  ;;  %142 = vrot.lane.b32.xlu1 %v964_v3, %s894_s11 }
  0x4c   :  { %193 = vrot.lane.b32.xlu0 %v964_v3, %s891_s8 }
  0x53   :  { %127 = vrot.lane.b32.xlu2 %v936_v1, %s895_s12  ;;  %125 = vrot.lane.b32.xlu1 %v964_v3, %s895_s12 }
  0x54   :  { %146 = vrot.lane.b32.xlu0 %v934_v0, %s894_s11 }
  0x5b   :  { %157 = vrot.lane.b32.xlu2 %v938_v2, %s893_s10  ;;  %174 = vrot.lane.b32.xlu1 %v938_v2, %s892_s9 }
  0x5c   :  { %129 = vrot.lane.b32.xlu0 %v934_v0, %s895_s12 }
  0x63   :  { %123 = vrot.lane.b32.xlu1 %v938_v2, %s895_s12 }
  0x64   :  { %140 = vrot.lane.b32.xlu0 %v938_v2, %s894_s11 }
  0x6d   :  { %v1006_v5 = vpop.permute.xlu2 %229 }
  0x75   :  { %v232_v8 = vpop.permute.xlu2 %231 }
  0x76   :  { %v234_v25 = vsel %vm1530_vm5, %v1006_v5, %v232_v8 }
  0x7d   :  { %v215_v16 = vpop.permute.xlu2 %214 }
  0x85   :  { %v249_v13 = vpop.permute.xlu1 %248  ;;  %v198_v24 = vpop.permute.xlu2 %197 }
  0x86   :  { %v243_v15 = vpop.permute.xlu0 %242 }
  0x87   :  { %v254_v17 = vsel %vm1531_vm2, %v249_v13, %v243_v15 }
  0x88   :  { %699 = vmatpush.msk.msra.mxu3 %vm1526_vm3, %v254_v17  ;;  %vm1528_vm3 = vmand %vm1089_vm11, %vm1106_vm15 }
  0x8d   :  { %v226_v19 = vpop.permute.xlu1 %225  ;;  %v1076_v33 = vpop.permute.xlu2 %176 }
  0x8e   :  { %v247_v21 = vpop.permute.xlu0 %246  ;;  %v237_v22 = vsel %vm1530_vm5, %v232_v8, %v226_v19 }
  0x8f   :  { %v251_v23 = vsel %vm1531_vm2, %v247_v21, %v249_v13  ;;  %700 = vmatpush.msk.msra.mxu3 %vm1011_vm0, %v237_v22  ;;  %v122_v22 = vld [vmem:[#allocation5] sm:$0xff] }
  0x90   :  { %691 = vmatpush.msk.msra.mxu2 %vm1035_vm4, %v251_v23 }
  0x92   :  { %311 = vmatpush.msra.mxu2 %v234_v25 }
  0x95   :  { %v213_v28 = vpop.permute.xlu1 %212  ;;  %v211_v43 = vpop.permute.xlu2 %210 }
  0x96   :  { %v209_v29 = vpop.permute.xlu0 %208  ;;  %v217_v30 = vsel %vm1529_vm7, %v213_v28, %v215_v16  ;;  %v218_v54 = vsel %vm1529_vm7, %v211_v43, %v213_v28 }
  0x97   :  { %v220_v31 = vsel %vm1529_vm7, %v215_v16, %v209_v29  ;;  %692 = vmatpush.msk.msra.mxu2 %vm1056_vm8, %v217_v30  ;;  %v219_v53 = vsel %vm1529_vm7, %v209_v29, %v211_v43  ;;  %vm1534_vm7 = vcmp.lt.s32.totalorder %v1008_v6, 15 }
  0x98   :  { %701 = vmatpush.msk.msra.mxu3 %vm1525_vm9, %v220_v31  ;;  %vm1126_vm9 = vcmp.ge.s32.totalorder %v82_v40, 1 }
  0x9d   :  { %v196_v34 = vpop.permute.xlu1 %195  ;;  %v164_v58 = vpop.permute.xlu2 %163 }
  0x9e   :  { %v192_v35 = vpop.permute.xlu0 %191  ;;  %v200_v36 = vsel %vm1533_vm10, %v196_v34, %v198_v24 }
  0x9f   :  { %v203_v39 = vsel %vm1533_vm10, %v198_v24, %v192_v35  ;;  %693 = vmatpush.msk.msra.mxu2 %vm1035_vm4, %v200_v36 }
  0xa0   :  { %702 = vmatpush.msk.msra.mxu3 %vm1015_vm1, %v203_v39 }
  0xa1   :  { %314 = vmatpush.msra.mxu2 %v936_v1 }
  0xa2   :  { %334 = vmatpush.msra.mxu3 %v934_v0 }
  0xa5   :  { %v228_v44 = vpop.permute.xlu1 %227  ;;  %v145_v7 = vpop.permute.xlu2 %144 }
  0xa6   :  { %v245_v46 = vpop.permute.xlu0 %244  ;;  %v236_v50 = vsel %vm1530_vm5, %v226_v19, %v228_v44  ;;  %v235_v51 = vsel %vm1530_vm5, %v228_v44, %v1006_v5 }
  0xa7   :  { %v253_v48 = vsel %vm1531_vm2, %v243_v15, %v245_v46  ;;  %v252_v49 = vsel %vm1531_vm2, %v245_v46, %v247_v21  ;;  %vm1536_vm2 = vcmp.lt.s32.totalorder %v1008_v6, 16  ;;  %v86_v21 = vand.u32 255, %v1008_v6 }
  0xa8   :  { %675 = vmatpush.msk.msra.mxu0 %vm1098_vm13, %v253_v48  ;;  %683 = vmatpush.msk.msra.mxu1 %vm1527_vm14, %v252_v49  ;;  %vm1535_vm14 = vcmp.lt.s32.totalorder %v1008_v6, 1 }
  0xaa   :  { %271 = vmatpush.msra.mxu0 %v236_v50  ;;  %684 = vmatpush.msk.msra.mxu1 %vm1089_vm11, %v235_v51 }
  0xac   :  { %676 = vmatpush.msk.msra.mxu0 %vm1126_vm9, %v219_v53  ;;  %685 = vmatpush.msk.msra.mxu1 %vm1528_vm3, %v218_v54  ;;  %vm1158_vm3 = vcmp.ge.s32.totalorder %v88_v57, 16 }
  0xad   :  { %v181_v55 = vpop.permute.xlu1 %180  ;;  %v1567_v61 = vsel %vm1158_vm3, 4294967295, %v1566_v61  ;;  %vm1532_vm5 = vmand %vm1158_vm3, %vm1035_vm4  ;;  %v128_v15 = vpop.permute.xlu2 %127 }
  0xae   :  { %v179_v56 = vpop.permute.xlu0 %178 }
  0xaf   :  { %v184_v59 = vsel %vm1535_vm14, %v1076_v33, %v179_v56  ;;  %v183_v60 = vsel %vm1535_vm14, %v179_v56, %v181_v55  ;;  %vm1209_vm14 = vcmp.ge.s32.totalorder %v86_v21, 16 }
  0xb0   :  { %694 = vmatpush.msk.msra.mxu2 %vm1056_vm8, %v184_v59  ;;  %703 = vmatpush.msk.msra.mxu3 %vm1051_vm6, %v183_v60 }
  0xb5   :  { %v162_v62 = vpop.permute.xlu1 %161  ;;  %v158_v24 = vpop.permute.xlu2 %157 }
  0xb6   :  { %v160_v63 = vpop.permute.xlu0 %159  ;;  %v166_v4 = vsel %vm1534_vm7, %v162_v62, %v164_v58 }
  0xb7   :  { %v167_v5 = vsel %vm1534_vm7, %v160_v63, %v162_v62  ;;  %704 = vmatpush.msk.msra.mxu3 %vm1015_vm1, %v166_v4  ;;  %vm1539_vm7 = vcmask 588800  }
  0xb8   :  { %695 = vmatpush.msk.msra.mxu2 %vm1532_vm5, %v167_v5  ;;  %vm1538_vm5 = vcmp.lt.s32.totalorder %v1008_v6, 17 }
  0xbd   :  { %v143_v8 = vpop.permute.xlu1 %142 }
  0xbe   :  { %v194_v9 = vpop.permute.xlu0 %193  ;;  %v150_v10 = vsel %vm1536_vm2, %v143_v8, %v145_v7 }
  0xbf   :  { %v202_v13 = vsel %vm1533_vm10, %v192_v35, %v194_v9  ;;  %v201_v14 = vsel %vm1533_vm10, %v194_v9, %v196_v34  ;;  %696 = vmatpush.msk.msra.mxu2 %vm1158_vm3, %v150_v10  ;;  %vm1537_vm10 = vmand %vm1158_vm3, %vm1056_vm8  ;;  %vm1575_vm3 = vcmask 588800  }
  0xc0   :  { %677 = vmatpush.msk.msra.mxu0 %vm1098_vm13, %v202_v13  ;;  %686 = vmatpush.msk.msra.mxu1 %vm1093_vm12, %v201_v14 }
  0xc2   :  { %274 = vmatpush.msra.mxu0 %v938_v2  ;;  %294 = vmatpush.msra.mxu1 %v964_v3 }
  0xc5   :  { %v126_v16 = vpop.permute.xlu1 %125 }
  0xc6   :  { %v147_v17 = vpop.permute.xlu0 %146  ;;  %v133_v18 = vsel %vm1538_vm5, %v126_v16, %v128_v15  ;;  %vm1542_vm5 = vmand %vm1209_vm14, %vm1098_vm13 }
  0xc7   :  { %v149_v19 = vsel %vm1536_vm2, %v145_v7, %v147_v17  ;;  %697 = vmatpush.msk.msra.mxu2 %vm1537_vm10, %v133_v18  ;;  %vm1570_vm2 = vcmp.lt.s32.totalorder %v1008_v6, 1 }
  0xc8   :  { %337 = vmatpush.msra.mxu3 %v149_v19  ;;  %698 = vmatmul.msk.f32.vlgmr.msra.gmra.mxu2 %vm1539_vm7, %v122_v22  ;;  %vm1571_vm10 = vmmov %vm1570_vm2  ;;  %vm1572_vm7 = vcmp.lt.s32.totalorder %v1008_v6, 17 }
  0xcd   :  { %v175_v25 = vpop.permute.xlu1 %174 }
  0xce   :  { %v130_v28 = vpop.permute.xlu0 %129  ;;  %v186_v29 = vsel %vm1570_vm2, %v181_v55, %v175_v25  ;;  %v185_v30 = vsel %vm1571_vm10, %v175_v25, %v1076_v33  ;;  %vm1573_vm2 = vcmp.lt.s32.totalorder %v1008_v6, 15 }
  0xcf   :  { %678 = vmatpush.msk.msra.mxu0 %vm1126_vm9, %v186_v29  ;;  %687 = vmatpush.msk.msra.mxu1 %vm1106_vm15, %v185_v30  ;;  %v132_v31 = vsel %vm1572_vm7, %v128_v15, %v130_v28  ;;  %v169_v32 = vsel %vm1573_vm2, %v164_v58, %v158_v24  ;;  %vm1574_vm10 = vmmov %vm1573_vm2  ;;  %vm1576_vm7 = vcmp.lt.s32.totalorder %v1008_v6, 16 }
  0xd0   :  { %705 = vmatpush.msk.msra.mxu3 %vm1051_vm6, %v132_v31  ;;  %v168_v33 = vsel %vm1574_vm10, %v158_v24, %v160_v63  ;;  %vm1577_vm2 = vmmov %vm1576_vm7 }
  0xd1   :  { %679 = vmatpush.msk.msra.mxu0 %vm1542_vm5, %v169_v32  ;;  %688 = vmatpush.msk.msra.mxu1 %vm1093_vm12, %v168_v33  ;;  %vm1545_vm10 = vmand %vm1209_vm14, %vm1126_vm9  ;;  %vm1578_vm5 = vcmp.lt.s32.totalorder %v1008_v6, 17 }
  0xd2   :  { %706 = vmatmul.msk.f32.vlgmr.msra.gmra.mxu3 %vm1575_vm3, %v122_v22  ;;  %vm1579_vm3 = vmmov %vm1578_vm5 }
  0xd5   :  { %v124_v34 = vpop.permute.xlu1 %123 }
  0xd6   :  { %v141_v35 = vpop.permute.xlu0 %140  ;;  %v135_v38 = vsel %vm1578_vm5, %v130_v28, %v124_v34  ;;  %v134_v39 = vsel %vm1579_vm3, %v124_v34, %v126_v16 }
  0xd7   :  { %v152_v36 = vsel %vm1576_vm7, %v147_v17, %v141_v35  ;;  %v151_v37 = vsel %vm1577_vm2, %v141_v35, %v143_v8  ;;  %vm1580_vm7 = vcmask 588800  }
  0xd8   :  { %680 = vmatpush.msk.msra.mxu0 %vm1209_vm14, %v152_v36  ;;  %297 = vmatpush.msra.mxu1 %v151_v37  ;;  %vm1581_vm2 = vmmov %vm1580_vm7 }
  0xda   :  { %681 = vmatpush.msk.msra.mxu0 %vm1545_vm10, %v135_v38  ;;  %689 = vmatpush.msk.msra.mxu1 %vm1106_vm15, %v134_v39 }
  0xdb   :  { %682 = vmatmul.msk.f32.vlgmr.msra.gmra.mxu0 %vm1580_vm7, %v122_v22  ;;  %690 = vmatmul.msk.f32.vlgmr.msra.gmra.mxu1 %vm1581_vm2, %v122_v22  ;;  %vm1582_vm7 = vcmp.lt.s32.totalorder %v1008_v6, 111  ;;  %vm1583_vm2 = vmand %vm1011_vm0, %vm1015_vm1 }
 0x14b   :  { %v320_v54 = vpop.f32.mrf.mxu2 }
 0x14c   :  { %v349_v55 = vmul.f32 0.2, %v320_v54 }
 0x155   :  { %v340_v48 = vpop.f32.mrf.mxu3 }
 0x156   :  { %v350_v51 = vmul.f32 0.2, %v340_v48  ;;  %vm346_vm3 = vcmp.ge.f32.partialorder %v340_v48, 0.0 }
 0x158   :  { %v280_v40 = vpop.f32.mrf.mxu0  ;;  %v300_v43 = vpop.f32.mrf.mxu1  ;;  %v1275_v53 = vsel %vm346_vm3, %v340_v48, %v350_v51  ;;  %vm1585_vm3 = vmmov %vm1582_vm7 }
 0x159   :  { %vm343_vm8 = vcmp.ge.f32.partialorder %v280_v40, 0.0  ;;  %v347_v44 = vmul.f32 0.2, %v280_v40  ;;  %vm344_vm5 = vcmp.ge.f32.partialorder %v300_v43, 0.0  ;;  %v348_v46 = vmul.f32 0.2, %v300_v43 }
 0x15b   :  { %v1265_v49 = vsel %vm343_vm8, %v280_v40, %v347_v44  ;;  %v1267_v50 = vsel %vm344_vm5, %v300_v43, %v348_v46  ;;  %vm345_vm8 = vcmp.ge.f32.partialorder %v320_v54, 0.0  ;;  %vm1584_vm5 = vcmp.lt.s32.totalorder %v1008_v6, 112 }
 0x15c   :  { %468 = vrot.lane.b32.xlu2 %v1265_v49, %s888_s2  ;;  %358 = vrot.lane.b32.xlu1 %v1267_v50, %s895_s12  ;;  %v1283_v56 = vsel %vm345_vm8, %v320_v54, %v349_v55  ;;  %vm1586_vm8 = vmmov %vm1585_vm3  ;;  %v355_v54 = vld [vmem:[#allocation7] sm:$0xff] }
 0x15d   :  { %374 = vrot.lane.b32.xlu0 %v1267_v50, %s894_s11 }
 0x164   :  { %452 = vrot.lane.b32.xlu2 %v1265_v49, %s889_s3  ;;  %474 = vrot.lane.b32.xlu1 %v1275_v53, %s888_s2 }
 0x165   :  { %454 = vrot.lane.b32.xlu0 %v1267_v50, %s889_s3 }
 0x16c   :  { %436 = vrot.lane.b32.xlu2 %v1265_v49, %s890_s7  ;;  %458 = vrot.lane.b32.xlu1 %v1275_v53, %s889_s3 }
 0x16d   :  { %472 = vrot.lane.b32.xlu0 %v1283_v56, %s888_s2 }
 0x174   :  { %420 = vrot.lane.b32.xlu2 %v1265_v49, %s891_s8  ;;  %442 = vrot.lane.b32.xlu1 %v1275_v53, %s890_s7 }
 0x175   :  { %456 = vrot.lane.b32.xlu0 %v1283_v56, %s889_s3 }
 0x17c   :  { %426 = vrot.lane.b32.xlu1 %v1275_v53, %s891_s8  ;;  %406 = vrot.lane.b32.xlu2 %v1267_v50, %s892_s9 }
 0x17d   :  { %440 = vrot.lane.b32.xlu0 %v1283_v56, %s890_s7 }
 0x184   :  { %410 = vrot.lane.b32.xlu1 %v1275_v53, %s892_s9  ;;  %390 = vrot.lane.b32.xlu2 %v1267_v50, %s893_s10 }
 0x185   :  { %424 = vrot.lane.b32.xlu0 %v1283_v56, %s891_s8 }
 0x18c   :  { %394 = vrot.lane.b32.xlu1 %v1275_v53, %s893_s10  ;;  %470 = vrot.lane.b32.xlu2 %v1267_v50, %s888_s2 }
 0x18d   :  { %408 = vrot.lane.b32.xlu0 %v1283_v56, %s892_s9 }
 0x194   :  { %376 = vrot.lane.b32.xlu1 %v1283_v56, %s894_s11  ;;  %378 = vrot.lane.b32.xlu2 %v1275_v53, %s894_s11 }
 0x195   :  { %392 = vrot.lane.b32.xlu0 %v1283_v56, %s893_s10 }
 0x19c   :  { %438 = vrot.lane.b32.xlu1 %v1267_v50, %s890_s7  ;;  %360 = vrot.lane.b32.xlu2 %v1283_v56, %s895_s12 }
 0x19d   :  { %362 = vrot.lane.b32.xlu0 %v1275_v53, %s895_s12 }
 0x1a4   :  { %388 = vrot.lane.b32.xlu1 %v1265_v49, %s893_s10  ;;  %422 = vrot.lane.b32.xlu2 %v1267_v50, %s891_s8 }
 0x1a5   :  { %404 = vrot.lane.b32.xlu0 %v1265_v49, %s892_s9 }
 0x1ac   :  { %372 = vrot.lane.b32.xlu2 %v1265_v49, %s894_s11 }
 0x1ad   :  { %356 = vrot.lane.b32.xlu0 %v1265_v49, %s895_s12 }
 0x1b6   :  { %v469_v57 = vpop.permute.xlu2 %468 }
 0x1be   :  { %v453_v58 = vpop.permute.xlu2 %452 }
 0x1c6   :  { %v1337_v59 = vpop.permute.xlu2 %436 }
 0x1ce   :  { %v1339_v60 = vpop.permute.xlu2 %420  ;;  %v1341_v62 = vpop.permute.xlu1 %358 }
 0x1cf   :  { %v1343_v63 = vpop.permute.xlu0 %374 }
 0x1d6   :  { %v475_v4 = vpop.permute.xlu1 %474  ;;  %v1345_v5 = vpop.permute.xlu2 %406 }
 0x1d7   :  { %v455_v7 = vpop.permute.xlu0 %454  ;;  %v479_v8 = vsel %vm1582_vm7, %v475_v4, %v469_v57  ;;  %vm1587_vm7 = vmmov %vm1585_vm3 }
 0x1d8   :  { %731 = vmatpush.msk.msrb.mxu3 %vm1583_vm2, %v479_v8  ;;  %vm1588_vm2 = vcmp.lt.s32.totalorder %v1008_v6, 113 }
 0x1de   :  { %v459_v9 = vpop.permute.xlu1 %458  ;;  %v1354_v10 = vpop.permute.xlu2 %390 }
 0x1df   :  { %v473_v13 = vpop.permute.xlu0 %472  ;;  %v463_v14 = vsel %vm1584_vm5, %v459_v9, %v453_v58  ;;  %vm1589_vm5 = vmand %vm1089_vm11, %vm1093_vm12 }
 0x1e0   :  { %v476_v15 = vsel %vm1585_vm3, %v473_v13, %v475_v4  ;;  %732 = vmatpush.msk.msrb.mxu3 %vm1011_vm0, %v463_v14  ;;  %vm1590_vm3 = vcmp.lt.s32.totalorder %v1008_v6, 112 }
 0x1e1   :  { %723 = vmatpush.msk.msrb.mxu2 %vm1035_vm4, %v476_v15 }
 0x1e6   :  { %v443_v16 = vpop.permute.xlu1 %442  ;;  %v471_v17 = vpop.permute.xlu2 %470 }
 0x1e7   :  { %v457_v18 = vpop.permute.xlu0 %456  ;;  %v478_v19 = vsel %vm1586_vm8, %v469_v57, %v471_v17  ;;  %v477_v21 = vsel %vm1587_vm7, %v471_v17, %v473_v13  ;;  %v447_v22 = vsel %vm1588_vm2, %v443_v16, %v1337_v59  ;;  %vm1591_vm8 = vmand %vm1011_vm0, %vm1051_vm6  ;;  %vm1596_vm0 = vnez %v1555_v27  ;;  %v567_v13 = vld [vmem:[#allocation8] sm:$0xff] }
 0x1e8   :  { %707 = vmatpush.msk.msrb.mxu0 %vm1098_vm13, %v478_v19  ;;  %715 = vmatpush.msk.msrb.mxu1 %vm1589_vm5, %v477_v21  ;;  %v460_v24 = vsel %vm1590_vm3, %v457_v18, %v459_v9  ;;  %vm1592_vm7 = vmmov %vm1590_vm3  ;;  %vm1594_vm5 = vcmp.lt.s32.totalorder %v1008_v6, 127 }
 0x1e9   :  { %535 = vmatpush.msrb.mxu2 %v460_v24  ;;  %733 = vmatpush.msk.msrb.mxu3 %vm1591_vm8, %v447_v22  ;;  %v462_v25 = vsel %vm1592_vm7, %v453_v58, %v455_v7  ;;  %vm1593_vm2 = vmmov %vm1590_vm3  ;;  %vm1595_vm3 = vcmp.lt.s32.totalorder %v1008_v6, 113  ;;  %vm1598_vm7 = vcmp.lt.s32.totalorder %v1008_v6, 1 }
 0x1ea   :  { %v461_v28 = vsel %vm1593_vm2, %v455_v7, %v457_v18  ;;  %495 = vmatpush.msrb.mxu0 %v462_v25  ;;  %vm1597_vm8 = vmmov %vm1594_vm5 }
 0x1eb   :  { %716 = vmatpush.msk.msrb.mxu1 %vm1089_vm11, %v461_v28  ;;  %vm1599_vm2 = vmmov %vm1598_vm7 }
 0x1ee   :  { %v427_v29 = vpop.permute.xlu1 %426  ;;  %v379_v35 = vpop.permute.xlu2 %378 }
 0x1ef   :  { %v441_v30 = vpop.permute.xlu0 %440  ;;  %v431_v11 = vsel %vm1594_vm5, %v427_v29, %v1339_v60  ;;  %vm1600_vm5 = vcmp.lt.s32.totalorder %v1008_v6, 15 }
 0x1f0   :  { %v444_v31 = vsel %vm1595_vm3, %v441_v30, %v443_v16  ;;  %734 = vmatpush.msk.msrb.mxu3 %vm1015_vm1, %v431_v11  ;;  %vm1601_vm3 = vmmov %vm1600_vm5 }
 0x1f1   :  { %724 = vmatpush.msk.msrb.mxu2 %vm1596_vm0, %v444_v31 }
 0x1f2   :  { %558 = vmatpush.msrb.mxu3 %v1275_v53 }
 0x1f6   :  { %v411_v32 = vpop.permute.xlu1 %410  ;;  %v361_v40 = vpop.permute.xlu2 %360 }
 0x1f7   :  { %v425_v33 = vpop.permute.xlu0 %424 }
 0x1f8   :  { %v428_v34 = vsel %vm1597_vm8, %v425_v33, %v427_v29  ;;  %vm1602_vm8 = vnez %v1567_v61 }
 0x1f9   :  { %725 = vmatpush.msk.msrb.mxu2 %vm1035_vm4, %v428_v34 }
 0x1fb   :  { %538 = vmatpush.msrb.mxu2 %v1283_v56 }
 0x1fe   :  { %v395_v36 = vpop.permute.xlu1 %394  ;;  %v423_v12 = vpop.permute.xlu2 %422 }
 0x1ff   :  { %v409_v37 = vpop.permute.xlu0 %408 }
 0x200   :  { %v413_v38 = vsel %vm1598_vm7, %v1345_v5, %v409_v37  ;;  %v412_v39 = vsel %vm1599_vm2, %v409_v37, %v411_v32  ;;  %vm1603_vm7 = vmand %vm1602_vm8, %vm1035_vm4  ;;  %vm1604_vm2 = vcmp.lt.s32.totalorder %v1008_v6, 16  ;;  %vm1608_vm4 = vcmask 588800  }
 0x201   :  { %726 = vmatpush.msk.msrb.mxu2 %vm1596_vm0, %v413_v38  ;;  %735 = vmatpush.msk.msrb.mxu3 %vm1051_vm6, %v412_v39  ;;  %vm1605_vm10 = vmmov %vm1604_vm2 }
 0x206   :  { %v377_v43 = vpop.permute.xlu1 %376  ;;  %v373_v7 = vpop.permute.xlu2 %372 }
 0x207   :  { %v393_v44 = vpop.permute.xlu0 %392  ;;  %v381_v51 = vsel %vm1604_vm2, %v1343_v63, %v377_v43  ;;  %v380_v53 = vsel %vm1605_vm10, %v377_v43, %v379_v35  ;;  %vm1609_vm10 = vcmp.lt.s32.totalorder %v1008_v6, 113 }
 0x208   :  { %v397_v46 = vsel %vm1600_vm5, %v1354_v10, %v393_v44  ;;  %v396_v48 = vsel %vm1601_vm3, %v393_v44, %v395_v36  ;;  %vm1606_vm5 = vcmp.lt.s32.totalorder %v1008_v6, 17  ;;  %vm1610_vm3 = vmmov %vm1609_vm10 }
 0x209   :  { %727 = vmatpush.msk.msrb.mxu2 %vm1603_vm7, %v397_v46  ;;  %736 = vmatpush.msk.msrb.mxu3 %vm1015_vm1, %v396_v48  ;;  %v365_v20 = vsel %vm1606_vm5, %v1341_v62, %v361_v40  ;;  %vm1607_vm1 = vmand %vm1602_vm8, %vm1596_vm0  ;;  %vm1613_vm7 = vcmp.lt.s32.totalorder %v1008_v6, 127 }
 0x20a   :  { %vm1611_vm0 = vmand %vm1089_vm11, %vm1106_vm15  ;;  %v430_v61 = vsel %vm1613_vm7, %v1339_v60, %v423_v12 }
 0x20b   :  { %728 = vmatpush.msk.msrb.mxu2 %vm1602_vm8, %v381_v51  ;;  %561 = vmatpush.msrb.mxu3 %v380_v53  ;;  %vm1612_vm8 = vmmov %vm1606_vm5 }
 0x20c   :  { %vm1614_vm2 = vmmov %vm1613_vm7 }
 0x20d   :  { %729 = vmatpush.msk.msrb.mxu2 %vm1607_vm1, %v365_v20  ;;  %vm1615_vm11 = vmmov %vm1608_vm4  ;;  %vm1618_vm1 = vcmp.lt.s32.totalorder %v1008_v6, 15 }
 0x20e   :  { %v439_v55 = vpop.permute.xlu1 %438  ;;  %730 = vmatmul.msk.f32.vlgmr.msrb.gmra.mxu2 %vm1608_vm4, %v355_v54  ;;  %vm1619_vm4 = vmmov %vm1618_vm1 }
 0x20f   :  { %v363_v56 = vpop.permute.xlu0 %362  ;;  %v446_v57 = vsel %vm1609_vm10, %v1337_v59, %v439_v55  ;;  %v445_v58 = vsel %vm1610_vm3, %v439_v55, %v441_v30  ;;  %v429_v59 = vsel %vm1614_vm2, %v423_v12, %v425_v33  ;;  %vm1620_vm10 = vmand %vm1209_vm14, %vm1098_vm13  ;;  %vm1621_vm3 = vcmp.lt.s32.totalorder %v1008_v6, 16 }
 0x210   :  { %708 = vmatpush.msk.msrb.mxu0 %vm1126_vm9, %v446_v57  ;;  %717 = vmatpush.msk.msrb.mxu1 %vm1611_vm0, %v445_v58  ;;  %v364_v27 = vsel %vm1612_vm8, %v361_v40, %v363_v56  ;;  %vm1622_vm0 = vmmov %vm1621_vm3 }
 0x211   :  { %737 = vmatpush.msk.msrb.mxu3 %vm1051_vm6, %v364_v27  ;;  %vm1616_vm6 = vcmp.lt.s32.totalorder %v1008_v6, 1  ;;  %v382_v8 = vsel %vm1622_vm0, %v373_v7, %v1343_v63  ;;  %vm1625_vm7 = vmmov %vm1615_vm11 }
 0x212   :  { %709 = vmatpush.msk.msrb.mxu0 %vm1098_vm13, %v430_v61  ;;  %718 = vmatpush.msk.msrb.mxu1 %vm1093_vm12, %v429_v59  ;;  %vm1617_vm5 = vmmov %vm1616_vm6 }
 0x213   :  { %738 = vmatmul.msk.f32.vlgmr.msrb.gmra.mxu3 %vm1615_vm11, %v355_v54  ;;  %vm1623_vm13 = vmmov %vm1612_vm8  ;;  %vm568_vm11 = vcmask 64512  }
 0x214   :  { %498 = vmatpush.msrb.mxu0 %v1265_v49  ;;  %518 = vmatpush.msrb.mxu1 %v1267_v50  ;;  %vm1626_vm2 = vmmov %vm1625_vm7 }
 0x216   :  { %v389_v26 = vpop.permute.xlu1 %388 }
 0x217   :  { %v405_v41 = vpop.permute.xlu0 %404  ;;  %v399_v49 = vsel %vm1618_vm1, %v395_v36, %v389_v26  ;;  %v398_v50 = vsel %vm1619_vm4, %v389_v26, %v1354_v10 }
 0x218   :  { %v415_v60 = vsel %vm1616_vm6, %v411_v32, %v405_v41  ;;  %v414_v4 = vsel %vm1617_vm5, %v405_v41, %v1345_v5  ;;  %v383_v5 = vsel %vm1621_vm3, %v379_v35, %v373_v7 }
 0x219   :  { %710 = vmatpush.msk.msrb.mxu0 %vm1126_vm9, %v415_v60  ;;  %719 = vmatpush.msk.msrb.mxu1 %vm1106_vm15, %v414_v4 }
 0x21b   :  { %711 = vmatpush.msk.msrb.mxu0 %vm1620_vm10, %v399_v49  ;;  %720 = vmatpush.msk.msrb.mxu1 %vm1093_vm12, %v398_v50  ;;  %vm1624_vm12 = vmand %vm1209_vm14, %vm1126_vm9 }
 0x21d   :  { %712 = vmatpush.msk.msrb.mxu0 %vm1209_vm14, %v383_v5  ;;  %521 = vmatpush.msrb.mxu1 %v382_v8 }
 0x21f   :  { %v357_v9 = vpop.permute.xlu0 %356 }
 0x220   :  { %v367_v45 = vsel %vm1612_vm8, %v363_v56, %v357_v9  ;;  %v366_v42 = vsel %vm1623_vm13, %v357_v9, %v1341_v62 }
 0x221   :  { %713 = vmatpush.msk.msrb.mxu0 %vm1624_vm12, %v367_v45  ;;  %721 = vmatpush.msk.msrb.mxu1 %vm1106_vm15, %v366_v42 }
 0x222   :  { %714 = vmatmul.msk.f32.vlgmr.msrb.gmra.mxu0 %vm1625_vm7, %v355_v54  ;;  %722 = vmatmul.msk.f32.vlgmr.msrb.gmra.mxu1 %vm1626_vm2, %v355_v54 }
 0x291   :  { %v544_v63 = vpop.f32.mrf.mxu2 }
 0x292   :  { %v545_v10 = vadd.f32 %v544_v63, %v936_v1 }
 0x294   :  { %627 = vmatpush.msra.mxu2 %v545_v10 }
 0x295   :  { %741 = vmatmul.msk.f32.vlgmr.msra.gmra.mxu2 %vm568_vm11, %v567_v13 }
 0x296   :  { %v564_v6 = vpop.f32.mrf.mxu3 }
 0x297   :  { %v565_v23 = vadd.f32 %v564_v6, %v934_v0 }
 0x299   :  { %647 = vmatpush.msra.mxu3 %v565_v23 }
 0x29a   :  { %742 = vmatmul.msk.f32.vlgmr.msra.gmra.mxu3 %vm568_vm11, %v567_v13 }
 0x29f   :  { %v504_v52 = vpop.f32.mrf.mxu0  ;;  %v524_v62 = vpop.f32.mrf.mxu1 }
 0x2a0   :  { %v505_v47 = vadd.f32 %v504_v52, %v938_v2  ;;  %v525_v14 = vadd.f32 %v524_v62, %v964_v3 }
 0x2a2   :  { %587 = vmatpush.msra.mxu0 %v505_v47  ;;  %607 = vmatpush.msra.mxu1 %v525_v14 }
 0x2a3   :  { %739 = vmatmul.msk.f32.vlgmr.msra.gmra.mxu0 %vm568_vm11, %v567_v13  ;;  %740 = vmatmul.msk.f32.vlgmr.msra.gmra.mxu1 %vm568_vm11, %v567_v13 }
 0x318   :  { %v629_v1 = vpop.f32.mrf.mxu2 }
 0x319   :  { %654 = vst [vmem:[#allocation10 + $0x10] sm:$0xff] %v629_v1 }
 0x31d   :  { %v649_v15 = vpop.f32.mrf.mxu3 }
 0x31e   :  { %655 = vst [vmem:[#allocation10 + $0x18] sm:$0xff] %v649_v15 }
 0x320   :  { %v589_v0 = vpop.f32.mrf.mxu0  ;;  %v609_v16 = vpop.f32.mrf.mxu1 }
 0x321   :  { %652 = vst [vmem:[#allocation10] sm:$0xff] %v589_v0 }
 0x322   :  { %653 = vst [vmem:[#allocation10 + $0x8] sm:$0xff] %v609_v16 }
 0x323   :  { %666 = dma.vmem_to_hbm [thread:$0]  %s662_s14, 512, %s664_s17, [#allocation4]  }
 0x324   :  { %882 = dma.done.wait [#allocation4], 512  }
 0x325   :  { %883 = vsyncadd [#allocation4], 4294966784 }
 0x326   :  { %671 = vsyncpa [#allocation3], 1 }
 0x327   :  { %672 = vsyncpa [#allocation6], 1 }
 0x328   :  { %673 = vsyncpa [#allocation9], 1 }
 0x329   :  { %674 = vsyncpa [#allocation4], 1 }

</bundles_post_ra>
